<compile_context>
chip_gen: v7x
topology: tpu7x:2x2x1
jax: 0.10.0
libtpu: 0.0.40
codegen_flags: <defaults>
</compile_context>

<pallas_src>
import functools

import jax
import jax.numpy as jnp
from jax import lax
from jax.experimental import pallas as pl
from jax.experimental.pallas import tpu as pltpu

_MIB = 1 << 20


# ------------------------------ VMEM budget ---------------------------------
@functools.lru_cache(maxsize=None)
def _vmem_budget_bytes() -> int:
    """Generation-aware scoped-VMEM budget (leaves compiler headroom)."""
    try:
        cap = int(pltpu.get_tpu_info().vmem_capacity_bytes)
    except Exception:  # pragma: no cover - conservative fallback
        cap = 64 * _MIB
    if cap <= 64 * _MIB:          # v7x: 64 MiB per TensorCore
        return 48 * _MIB
    return 100 * _MIB             # v5e / v6e: 128 MiB physical


def _pick_tile(n_pad: int, c: int, itemsize: int, budget: int) -> int:
    """Largest multiple-of-128 divisor of n_pad whose footprint fits budget."""
    for tn in range(n_pad, 0, -128):
        if n_pad % tn:
            continue
        # pass 1: x double-buffer + (C,C) f32 scratch + attention out dbuf
        v1 = 2 * c * tn * itemsize + c * c * 4 + 2 * c * c * itemsize
        # pass 2: attention dbuf + x dbuf + out dbuf + f32 acc headroom
        v2 = (2 * c * c * itemsize + 2 * c * tn * itemsize
              + 2 * c * tn * itemsize + c * tn * 4)
        if max(v1, v2) <= budget:
            return tn
    return 128


# ------------------------------ pass 1 ---------------------------------------
def _energy_kernel(x_ref, attn_ref, energy_acc):
    """Accumulate energy = x @ x.T over spatial tiles; softmax at last tile."""
    k = pl.program_id(1)

    @pl.when(k == 0)
    def _():
        energy_acc[...] = jnp.zeros_like(energy_acc)

    x = x_ref[...]  # (C, TN) in native dtype -> feeds the MXU directly.
    # NT matmul (contract the spatial tile axis); Mosaic feeds the transposed
    # operand into the MXU without a separate materialized transpose.
    energy_acc[...] += lax.dot_general(
        x, x,
        dimension_numbers=(((1,), (1,)), ((), ())),
        preferred_element_type=jnp.float32,
    )

    @pl.when(k == pl.num_programs(1) - 1)
    def _():
        energy = energy_acc[...]
        # softmax(rowmax(E) - E) == exp(rowmin(E) - E) / sum.
        e = jnp.exp(jnp.min(energy, axis=-1, keepdims=True) - energy)
        denom = jnp.sum(e, axis=-1, keepdims=True)
        # Exact division (once per batch element) and store in input dtype.
        attn_ref[...] = (e / denom).astype(attn_ref.dtype)


# ------------------------------ pass 2 ---------------------------------------
def _apply_kernel(gamma_ref, attn_ref, x_ref, o_ref):
    """o_tile = gamma * (attention @ x_tile) + x_tile (fused, lane-dense)."""
    x = x_ref[...]                                       # (C, TN) native dtype
    acc = jnp.dot(attn_ref[...], x, preferred_element_type=jnp.float32)
    gamma = gamma_ref[0]
    o_ref[...] = (gamma * acc).astype(o_ref.dtype) + x


# ------------------------------ fused single pass ----------------------------
def _fused_kernel(gamma_ref, x_ref, o_ref):
    """Whole batch-element slab resident: energy + softmax + apply + residual."""
    x = x_ref[...]                                       # (C, N)
    energy = lax.dot_general(
        x, x,
        dimension_numbers=(((1,), (1,)), ((), ())),
        preferred_element_type=jnp.float32,
    )
    e = jnp.exp(jnp.min(energy, axis=-1, keepdims=True) - energy)
    attn = (e / jnp.sum(e, axis=-1, keepdims=True)).astype(x.dtype)
    acc = jnp.dot(attn, x, preferred_element_type=jnp.float32)
    gamma = gamma_ref[0]
    o_ref[...] = (gamma * acc).astype(o_ref.dtype) + x


# ------------------------------ dispatch helpers ------------------------------
def _cam_fused(x_flat, gamma, budget):
    B, C, Np = x_flat.shape
    return pl.pallas_call(
        _fused_kernel,
        out_shape=jax.ShapeDtypeStruct((B, C, Np), x_flat.dtype),
        grid_spec=pltpu.PrefetchScalarGridSpec(
            num_scalar_prefetch=0,
            grid=(B,),
            in_specs=[
                pl.BlockSpec(memory_space=pltpu.MemorySpace.SMEM),   # gamma
                pl.BlockSpec((pl.Squeezed(), C, Np), lambda b: (b, 0, 0)),
            ],
            out_specs=pl.BlockSpec((pl.Squeezed(), C, Np), lambda b: (b, 0, 0)),
        ),
        compiler_params=pltpu.CompilerParams(
            dimension_semantics=("parallel",),
            vmem_limit_bytes=budget,
        ),
    )(gamma, x_flat)


def _cam_two_pass(x_flat, gamma, tn, budget):
    B, C, Np = x_flat.shape
    n_tiles = Np // tn

    # ---- pass 1: attention (B, C, C) in x.dtype -----------------------------
    attention = pl.pallas_call(
        _energy_kernel,
        out_shape=jax.ShapeDtypeStruct((B, C, C), x_flat.dtype),
        grid_spec=pltpu.PrefetchScalarGridSpec(
            num_scalar_prefetch=0,
            grid=(B, n_tiles),
            in_specs=[
                pl.BlockSpec((pl.Squeezed(), C, tn), lambda b, k: (b, 0, k)),
            ],
            out_specs=pl.BlockSpec((pl.Squeezed(), C, C), lambda b, k: (b, 0, 0)),
            scratch_shapes=[pltpu.VMEM((C, C), jnp.float32)],
        ),
        compiler_params=pltpu.CompilerParams(
            dimension_semantics=("parallel", "arbitrary"),
            vmem_limit_bytes=budget,
        ),
    )(x_flat)

    # ---- pass 2: out = gamma * attention @ x + x ----------------------------
    out_flat = pl.pallas_call(
        _apply_kernel,
        out_shape=jax.ShapeDtypeStruct((B, C, Np), x_flat.dtype),
        grid_spec=pltpu.PrefetchScalarGridSpec(
            num_scalar_prefetch=0,
            grid=(B, n_tiles),
            in_specs=[
                pl.BlockSpec(memory_space=pltpu.MemorySpace.SMEM),   # gamma
                pl.BlockSpec((pl.Squeezed(), C, C), lambda b, t: (b, 0, 0)),
                pl.BlockSpec((pl.Squeezed(), C, tn), lambda b, t: (b, 0, t)),
            ],
            out_specs=pl.BlockSpec((pl.Squeezed(), C, tn), lambda b, t: (b, 0, t)),
        ),
        compiler_params=pltpu.CompilerParams(
            dimension_semantics=("parallel", "parallel"),
            vmem_limit_bytes=budget,
        ),
    )(gamma, attention, x_flat)
    return out_flat


# ------------------------------ public wrapper --------------------------------
@functools.partial(jax.jit, static_argnames=("force_two_pass",))
def cam_module(x, gamma, force_two_pass: bool = False):
    """x: (B, C, H, W); gamma: (1,).  Returns gamma * (softmax-attn @ x) + x."""
    B, C, H, W = x.shape
    N = H * W
    N_pad = ((N + 127) // 128) * 128           # lane-dense spatial extent
    x_flat = x.reshape(B, C, N)
    if N_pad != N:
        # Zero columns contribute 0 to energy and to attention @ x.
        x_flat = jnp.pad(x_flat, ((0, 0), (0, 0), (0, N_pad - N)))
    gamma = gamma.astype(jnp.float32).reshape(1)

    budget = _vmem_budget_bytes()
    itemsize = jnp.dtype(x.dtype).itemsize

    # Fused path: one HBM read of x when a whole (C, N) slab fits.
    fused_bytes = (4 * C * N_pad * itemsize      # x + out double buffers
                   + 2 * C * N_pad * 4           # f32 matmul result / temps
                   + 4 * C * C * 4)              # energy / attention temps
    if (not force_two_pass) and fused_bytes <= budget:
        out_flat = _cam_fused(x_flat, gamma, budget)
    else:
        tn = _pick_tile(N_pad, C, itemsize, budget)
        out_flat = _cam_two_pass(x_flat, gamma, tn, budget)

    if N_pad != N:
        out_flat = out_flat[:, :, :N]
    return out_flat.reshape(B, C, H, W)


# ------------------------------ reference -------------------------------------
def _reference(x, gamma):
    B, C, H, W = x.shape
    q = x.reshape(B, C, -1)                          # (B, C, N)
    energy = jnp.einsum("bcn,bdn->bcd", q, q)        # (B, C, C)
    energy_new = jnp.max(energy, axis=-1, keepdims=True) - energy
    attention = jax.nn.softmax(energy_new, axis=-1)
    out = jnp.einsum("bcd,bdn->bcn", attention, q).reshape(B, C, H, W)
    return gamma[0] * out + x


if __name__ == "__main__":
    key = jax.random.PRNGKey(0)
    B, C, H, W = 2, 4, 16, 16
    x = jax.random.normal(key, (B, C, H, W), dtype=jnp.float32)

    # nn.Parameter(torch.zeros(1)) -> gamma initialized to 0; also exercise a
    # nonzero gamma so the attention path matters.  Test both the fused path
    # (default at this size) and the tiled two-pass path.
    for gval in (0.0, 0.5):
        gamma = jnp.array([gval], dtype=jnp.float32)
        ref = _reference(x, gamma)
        for force in (False, True):
            out = cam_module(x, gamma, force_two_pass=force)
            jax.block_until_ready(out)
            err = float(jnp.max(jnp.abs(out - ref)))
            assert jnp.allclose(out, ref, atol=2e-3, rtol=2e-3), (
                f"mismatch gamma={gval} two_pass={force}: max abs err {err}"
            )

    print("KERNEL_OK")
</pallas_src>

<mosaic_0001>
module attributes {stable_mosaic.version = 11 : i64} {
  func.func @_fused_kernel(%arg0: i32, %arg1: memref<1xf32, #tpu.memory_space<smem>>, %arg2: memref<1x4x256xf32, #tpu.memory_space<vmem>>, %arg3: memref<1x4x256xf32, #tpu.memory_space<vmem>>) attributes {dimension_semantics = [#tpu.dimension_semantics<parallel>], iteration_bounds = array<i64: 2>, scalar_prefetch = 0 : i64, scratch_operands = 0 : i64, tpu.core_type = #tpu.core_type<tc>, window_params = [{transform_indices = @transform_0, window_bounds = array<i64: 1>}, {transform_indices = @transform_1, window_bounds = array<i64: 1, 4, 256>}, {transform_indices = @transform_2, window_bounds = array<i64: 1, 4, 256>}]} {
    %c0 = arith.constant 0 : index
    %c0_0 = arith.constant 0 : index
    %c0_1 = arith.constant 0 : index
    %0 = vector.load %arg2[%c0, %c0_0, %c0_1] : memref<1x4x256xf32, #tpu.memory_space<vmem>>, vector<1x4x256xf32>
    %1 = vector.shape_cast %0 : vector<1x4x256xf32> to vector<4x256xf32>
    %cst = arith.constant dense<0.000000e+00> : vector<4x4xf32>
    %2 = tpu.matmul %1, %1, %cst {dimension_numbers = #tpu.dot_dimension_numbers<[1], [1], [0], [0], [0, 0, 1, 0], [], []>} : vector<4x256xf32>, vector<4x256xf32>, vector<4x4xf32> -> vector<4x4xf32>
    %cst_2 = arith.constant dense<0x7F800000> : vector<4xf32>
    %3 = vector.multi_reduction <minimumf>, %2, %cst_2 [1] : vector<4x4xf32> to vector<4xf32>
    %4 = vector.shape_cast %3 : vector<4xf32> to vector<4x1xf32>
    %5 = vector.broadcast %4 : vector<4x1xf32> to vector<4x4xf32>
    %6 = arith.subf %5, %2 : vector<4x4xf32>
    %7 = math.exp %6 : vector<4x4xf32>
    %cst_3 = arith.constant dense<0.000000e+00> : vector<4xf32>
    %8 = vector.multi_reduction <add>, %7, %cst_3 [1] : vector<4x4xf32> to vector<4xf32>
    %9 = vector.shape_cast %8 : vector<4xf32> to vector<4x1xf32>
    %10 = vector.broadcast %9 : vector<4x1xf32> to vector<4x4xf32>
    %11 = arith.divf %7, %10 : vector<4x4xf32>
    %cst_4 = arith.constant dense<0.000000e+00> : vector<4x256xf32>
    %12 = tpu.matmul %11, %1, %cst_4 {dimension_numbers = #tpu.dot_dimension_numbers<[1], [0], [0], [1], [0, 0, 1, 1], [], []>} : vector<4x4xf32>, vector<4x256xf32>, vector<4x256xf32> -> vector<4x256xf32>
    %c0_5 = arith.constant 0 : index
    %13 = memref.load %arg1[%c0_5] : memref<1xf32, #tpu.memory_space<smem>>
    %14 = vector.broadcast %13 : f32 to vector<4x256xf32>
    %15 = arith.mulf %14, %12 : vector<4x256xf32>
    %16 = arith.addf %15, %1 : vector<4x256xf32>
    %c0_6 = arith.constant 0 : index
    %c0_7 = arith.constant 0 : index
    %c0_8 = arith.constant 0 : index
    %17 = vector.load %arg3[%c0_6, %c0_7, %c0_8] : memref<1x4x256xf32, #tpu.memory_space<vmem>>, vector<1x4x256xf32>
    %18 = vector.shape_cast %17 : vector<1x4x256xf32> to vector<4x256xf32>
    %19 = vector.shape_cast %16 : vector<4x256xf32> to vector<1x4x256xf32>
    tpu.vector_store %arg3[%c0_6, %c0_7, %c0_8], %19 {strides = array<i32>} : memref<1x4x256xf32, #tpu.memory_space<vmem>>, vector<1x4x256xf32>,
    return
  }
  func.func @transform_0(%arg0: i32) -> i32 {
    %c0_i32 = arith.constant 0 : i32
    %c0_i32_0 = arith.constant 0 : i32
    return %c0_i32 : i32
  }
  func.func @transform_1(%arg0: i32) -> (i32, i32, i32) {
    %c0_i32 = arith.constant 0 : i32
    %c0_i32_0 = arith.constant 0 : i32
    %c0_i32_1 = arith.constant 0 : i32
    return %arg0, %c0_i32, %c0_i32_0 : i32, i32, i32
  }
  func.func @transform_2(%arg0: i32) -> (i32, i32, i32) {
    %c0_i32 = arith.constant 0 : i32
    %c0_i32_0 = arith.constant 0 : i32
    %c0_i32_1 = arith.constant 0 : i32
    return %arg0, %c0_i32, %c0_i32_0 : i32, i32, i32
  }
}

</mosaic_0001>

<bundles_post_ra>
// kernel: cam_module.1
= control target key start
LH: loop header
LB: loop body
LE: loop exit
PB: predicated region body
PF: predicated region fallthrough
CT: control target
= control target key end

     0   :  { %s434_s11 = smov 0   ;;  %s458_s0 = inlined_call_operand.<no memory space> [shape: f32[1], index: 0, kind: input, shape index: {}]   ;;  %s459_s1 = inlined_call_operand.vmem [shape: f32[2,4,256], index: 1, kind: input, shape index: {}]   ;;  %s460_s2 = inlined_call_operand.vmem [shape: f32[2,4,256], index: 2, kind: output, shape index: {}]  }
   0x1   :  { %7 = sst [smem:[#allocation2]] %s458_s0 }
   0x2 LB: > { %s377_s12 = sadd.s32 4294967295, %s413_s11   ;;  %p381_p0 = scmp.ge.s32.totalorder %s413_s11, 1  ;;  %s413_s11 = sphi %s434_s11, %s13_s11  }
   0x3   : > { %p113_p1 = scmp.lt.s32.totalorder %s413_s11, 3 }
   0x5   : > { %p114_p2 = pnand %p381_p0, %p113_p1 }
   0x6   : > { %p135_p3 = scmp.lt.s32.totalorder (!%p114_p2), %s377_s12, 1  ;;  %vm219_vm0 = vcmask (!%p114_p2), 27648   ;;  %vm235_vm1 = vcmask (!%p114_p2), 1043456   ;;  %v415_v10 = vmov (!%p114_p2), 0.0   ;;  %vm231_vm2 = vcmask (!%p114_p2), 31744   ;;  %s311_s16 = sld [smem:[#allocation2]] (!%p114_p2) }
   0x7   : > { %117 = sbr.rel (%p114_p2) target bundleno = 770 (0x302), region = 28  ;;  %304 = vmatprep.mubr.f32.mxu1 (!%p114_p2), %v415_v10 }
   0xc   : > { %v312_v14 = vstv (!%p114_p2), %s311_s16 }
   0xe   : > { %s462_s12 = smov (!%p135_p3, %s377_s12), 1 }
   0xf   : > { %s391_s0 = sshll.u32 %s462_s12, 3 }
  0x10   : > { %s139_s15 = scalar_lea.vmem %s459_s1, %s391_s0  ;;  %s144_s19 = scalar_lea.vmem %s460_s2, %s391_s0 }
  0x11   : > { %v145_v0 = vld [vmem:[%s139_s15] sm:$0xff] }
  0x12   : > { %v147_v1 = vcombine.high %v145_v0, %v145_v0 }
  0x14   : > { %149 = vmatprep.subr.mxu0 %v147_v1  ;;  %213 = vmatprep.mubr.f32.mxu0 %v147_v1 }
  0x15   : > { %150 = vmatpush1.xpose.msra.mxu0 %v145_v0  ;;  %386 = vmatprep.subr.msk.mxu1 %vm235_vm1, %v147_v1 }
  0x16   : > { %387 = vmatpush1.msk.msra.mxu1 %vm235_vm1, %v145_v0 }
  0x18   : > { %214 = vmatmul.mubr.f32.vlgmr.msra.gmra.mrb[0].mxu0 %v145_v0 }
  0xeb   : > { %v215_v2 = vpop.f32.mrb[0].mxu0 }
  0xec   : > { %v217_v3 = vpop.f32.mrb[1].mxu0  ;;  %v220_v4 = vsel %vm219_vm0, %v215_v2, inf }
  0xed   : > { %221 = vmin.xlane.f32.xlu0 %v220_v4 }
 0x17a   : > { %v222_v5 = vpop.xlane.xlu0 %221 }
 0x17b   : > { %v223_v6 = vsub.f32 %v222_v5, %v215_v2 }
 0x17d   : > { %v224_v7 = vmul.f32 1.442695, %v223_v6 }
 0x17f   : > { %403 = vpow2.f32 %v224_v7 }
 0x189   : > { %v404_v8 = vpop.eup %403 }
 0x18a   : > { %v226_v9 = vsel %vm219_vm0, %v404_v8, 0.0 }
 0x18b   : > { %227 = vadd.xlane.f32.xlu0 %v226_v9 }
 0x218   : > { %v228_v11 = vpop.xlane.xlu0 %227 }
 0x219   : > { %405 = vrcp.f32 %v228_v11 }
 0x223   : > { %v406_v12 = vpop.eup %405 }
 0x224   : > { %v230_v13 = vmul.f32 %v406_v12, %v404_v8 }
 0x226   : > { %388 = vmatmul.mubr.msk.f32.vlgmr.msra.gmra.mrb[0].mxu1 %vm231_vm2, %v230_v13 }
 0x2f9   : > { %v306_v15 = vpop.f32.mrb[0].mxu1 }
 0x2fa   : > { %v313_v16 = vmul.f32 %v312_v14, %v306_v15  ;;  %v308_v17 = vpop.f32.mrb[1].mxu1 }
 0x2fb   : > { %v314_v18 = vmul.f32 %v312_v14, %v308_v17 }
 0x2fc   : > { %v315_v19 = vadd.f32 %v313_v16, %v145_v0 }
 0x2fd   : > { %v316_v20 = vadd.f32 %v314_v18, %v147_v1 }
 0x2ff   : > { %v319_v21 = vcombine.low %v315_v19, %v316_v20 }
 0x301   : > { %321 = vst [vmem:[%s144_s19] sm:$0xff] %v319_v21 }
 0x302 PF: > { %s13_s11 = sadd.s32 1, %s413_s11  }
 0x303   : > { %p10_p4 = scmp.ge.s32.totalorder %s13_s11, 4  }
 0x305   :  { %12 = sbr.rel (!%p10_p4) target bundleno = 2 (0x2), region = 58 }

</bundles_post_ra>
